<compile_context>
chip_gen: v7x
topology: tpu7x:2x2x1
jax: 0.10.0
libtpu: 0.0.40
codegen_flags: <defaults>
</compile_context>

<pallas_src>
import math
import functools
import jax
import jax.numpy as jnp
from jax.experimental import pallas as pl
from jax.experimental.pallas import tpu as pltpu

NUM_MOTIFS = 100      # V
EMBED_DIM = 32        # D
BIO_DIM = 16          # F
BATCH = 2
SEQ = 8

SUBLANE = 8
MAX_TILE_N = 2048     # token rows per grid step for large inputs


def _round_up(x, m):
    return ((x + m - 1) // m) * m


def motif_embedding_kernel(bio_ref, ids_ref, w_ref, b_ref, emb_ref, out_ref,
                           *, num_motifs):
    # bio_ref: [tn, F] f32   streamed bio features
    # ids_ref: [tn, 1] i32   streamed motif ids (int32 -> exact for any V)
    # w_ref:   [F, D]  f32   resident projection weight
    # b_ref:   [1, D]  f32   resident projection bias
    # emb_ref: [V, D]  f32   resident embedding table
    # out_ref: [tn, D] f32
    tn = bio_ref.shape[0]
    bio = bio_ref[...]
    ids = ids_ref[...]

    # One-hot gather of the embedding rows via the MXU.  iota only spans
    # [0, V), so out-of-range / negative ids (incl. the -1 padding rows)
    # contribute a zero embedding instead of raising like nn.Embedding;
    # the explicit guard documents that intent.
    iota = jax.lax.broadcasted_iota(jnp.int32, (tn, num_motifs), 1)
    valid = jnp.logical_and(ids >= 0, ids < num_motifs)           # [tn, 1]
    one_hot = jnp.logical_and(iota == ids, valid).astype(jnp.float32)

    emb = jnp.dot(one_hot, emb_ref[...],
                  preferred_element_type=jnp.float32)             # [tn, D]
    proj = jnp.dot(bio, w_ref[...],
                   preferred_element_type=jnp.float32)            # [tn, D]
    out_ref[...] = (emb + proj + b_ref[...]).astype(out_ref.dtype)


def motif_embedding(motif_ids, biological_features, emb_table, w, b):
    """motif_ids: [B, S] int; biological_features: [B, S, F] f32.
    Returns [B, S, D] f32 = emb_table[motif_ids] + bio @ W + b."""
    B, S = motif_ids.shape
    F = biological_features.shape[-1]
    V, D = emb_table.shape
    N = B * S

    # Row tiling: big tiles amortize the ~0.35us/step pipeline overhead,
    # tile_n is chosen to minimize row padding, and once N >= 1024 we force
    # at least two grid steps so the "parallel" axis can shard across v7x's
    # two TensorCores.
    n_tiles = pl.cdiv(N, MAX_TILE_N)
    if N >= 1024:
        n_tiles = max(n_tiles, 2)
    tile_n = _round_up(pl.cdiv(N, n_tiles), SUBLANE)
    n_tiles = pl.cdiv(N, tile_n)
    n_pad = n_tiles * tile_n

    # No wide slab: reshape is free; rows are only padded when N is ragged.
    bio = biological_features.reshape(N, F).astype(jnp.float32)
    ids = motif_ids.reshape(N, 1).astype(jnp.int32)
    if n_pad != N:
        bio = jnp.pad(bio, ((0, n_pad - N), (0, 0)))
        # Padding rows get id=-1 so they produce a zero embedding; they are
        # sliced off below either way.
        ids = jnp.pad(ids, ((0, n_pad - N), (0, 0)), constant_values=-1)

    w = w.astype(jnp.float32)
    b2d = b.reshape(1, D).astype(jnp.float32)
    emb_table = emb_table.astype(jnp.float32)

    kernel = functools.partial(motif_embedding_kernel, num_motifs=V)
    out = pl.pallas_call(
        kernel,
        out_shape=jax.ShapeDtypeStruct((n_pad, D), jnp.float32),
        grid=(n_tiles,),
        in_specs=[
            pl.BlockSpec((tile_n, F), lambda i: (i, 0)),   # bio (streamed)
            pl.BlockSpec((tile_n, 1), lambda i: (i, 0)),   # ids (streamed)
            pl.BlockSpec((F, D), lambda i: (0, 0)),        # W   (resident)
            pl.BlockSpec((1, D), lambda i: (0, 0)),        # b   (resident)
            pl.BlockSpec((V, D), lambda i: (0, 0)),        # emb (resident)
        ],
        out_specs=pl.BlockSpec((tile_n, D), lambda i: (i, 0)),
        compiler_params=pltpu.CompilerParams(
            dimension_semantics=("parallel",)),
    )(bio, ids, w, b2d, emb_table)

    return out[:N].reshape(B, S, D)


def init_params(key):
    """Deterministic init mimicking the PyTorch module's parameter shapes."""
    k_emb, k_w, k_b = jax.random.split(key, 3)
    # nn.Embedding: N(0, 1)
    emb_table = jax.random.normal(k_emb, (NUM_MOTIFS, EMBED_DIM), jnp.float32)
    # nn.Linear(BIO_DIM, EMBED_DIM): uniform(-1/sqrt(F), 1/sqrt(F))
    bound = 1.0 / math.sqrt(BIO_DIM)
    # Stored transposed vs PyTorch ([F, D] instead of [D, F]).
    w = jax.random.uniform(k_w, (BIO_DIM, EMBED_DIM), jnp.float32,
                           minval=-bound, maxval=bound)
    b = jax.random.uniform(k_b, (EMBED_DIM,), jnp.float32,
                           minval=-bound, maxval=bound)
    return emb_table, w, b


if __name__ == "__main__":
    key = jax.random.PRNGKey(0)
    k_params, k_ids, k_bio = jax.random.split(key, 3)

    emb_table, w, b = init_params(k_params)

    motif_ids = jax.random.randint(k_ids, (BATCH, SEQ), 0, NUM_MOTIFS,
                                   dtype=jnp.int32)
    bio_features = jax.random.normal(k_bio, (BATCH, SEQ, BIO_DIM), jnp.float32)

    out = motif_embedding(motif_ids, bio_features, emb_table, w, b)
    out = jax.block_until_ready(out)

    # Pure-JAX reference check (same semantics as the PyTorch forward).
    ref = emb_table[motif_ids] + (bio_features @ w + b)
    assert out.shape == (BATCH, SEQ, EMBED_DIM)
    assert jnp.allclose(out, ref, atol=1e-4, rtol=1e-4)

    print("KERNEL_OK")
</pallas_src>

<mosaic_0001>
module attributes {stable_mosaic.version = 11 : i64} {
  func.func @motif_embedding_kernel(%arg0: i32, %arg1: memref<16x16xf32, #tpu.memory_space<vmem>>, %arg2: memref<16x1xi32, #tpu.memory_space<vmem>>, %arg3: memref<16x32xf32, #tpu.memory_space<vmem>>, %arg4: memref<1x32xf32, #tpu.memory_space<vmem>>, %arg5: memref<100x32xf32, #tpu.memory_space<vmem>>, %arg6: memref<16x32xf32, #tpu.memory_space<vmem>>) attributes {dimension_semantics = [#tpu.dimension_semantics<parallel>], iteration_bounds = array<i64: 1>, scalar_prefetch = 0 : i64, scratch_operands = 0 : i64, tpu.core_type = #tpu.core_type<tc>, window_params = [{transform_indices = @transform_0, window_bounds = array<i64: 16, 16>}, {transform_indices = @transform_1, window_bounds = array<i64: 16, 1>}, {pipeline_mode = #tpu.pipeline_mode<synchronous>, transform_indices = @transform_2, window_bounds = array<i64: 16, 32>}, {pipeline_mode = #tpu.pipeline_mode<synchronous>, transform_indices = @transform_3, window_bounds = array<i64: 1, 32>}, {pipeline_mode = #tpu.pipeline_mode<synchronous>, transform_indices = @transform_4, window_bounds = array<i64: 100, 32>}, {transform_indices = @transform_5, window_bounds = array<i64: 16, 32>}]} {
    %c0 = arith.constant 0 : index
    %c0_0 = arith.constant 0 : index
    %0 = vector.load %arg1[%c0, %c0_0] : memref<16x16xf32, #tpu.memory_space<vmem>>, vector<16x16xf32>
    %c0_1 = arith.constant 0 : index
    %c0_2 = arith.constant 0 : index
    %1 = vector.load %arg2[%c0_1, %c0_2] : memref<16x1xi32, #tpu.memory_space<vmem>>, vector<16x1xi32>
    %2 = tpu.iota {dimensions = array<i32: 1>} : vector<16x100xi32>
    %c0_i32 = arith.constant 0 : i32
    %3 = vector.broadcast %c0_i32 : i32 to vector<16x1xi32>
    %4 = arith.cmpi sge, %1, %3 : vector<16x1xi32>
    %c100_i32 = arith.constant 100 : i32
    %5 = vector.broadcast %c100_i32 : i32 to vector<16x1xi32>
    %6 = arith.cmpi slt, %1, %5 : vector<16x1xi32>
    %7 = arith.andi %4, %6 : vector<16x1xi1>
    %8 = vector.broadcast %1 : vector<16x1xi32> to vector<16x100xi32>
    %9 = arith.cmpi eq, %2, %8 : vector<16x100xi32>
    %10 = vector.broadcast %7 : vector<16x1xi1> to vector<16x100xi1>
    %11 = arith.andi %9, %10 : vector<16x100xi1>
    %12 = arith.extui %11 : vector<16x100xi1> to vector<16x100xi32>
    %13 = arith.sitofp %12 : vector<16x100xi32> to vector<16x100xf32>
    %c0_3 = arith.constant 0 : index
    %c0_4 = arith.constant 0 : index
    %14 = vector.load %arg5[%c0_3, %c0_4] : memref<100x32xf32, #tpu.memory_space<vmem>>, vector<100x32xf32>
    %cst = arith.constant dense<0.000000e+00> : vector<16x32xf32>
    %15 = tpu.matmul %13, %14, %cst {dimension_numbers = #tpu.dot_dimension_numbers<[1], [0], [0], [1], [0, 0, 1, 1], [], []>} : vector<16x100xf32>, vector<100x32xf32>, vector<16x32xf32> -> vector<16x32xf32>
    %c0_5 = arith.constant 0 : index
    %c0_6 = arith.constant 0 : index
    %16 = vector.load %arg3[%c0_5, %c0_6] : memref<16x32xf32, #tpu.memory_space<vmem>>, vector<16x32xf32>
    %cst_7 = arith.constant dense<0.000000e+00> : vector<16x32xf32>
    %17 = tpu.matmul %0, %16, %cst_7 {dimension_numbers = #tpu.dot_dimension_numbers<[1], [0], [0], [1], [0, 0, 1, 1], [], []>} : vector<16x16xf32>, vector<16x32xf32>, vector<16x32xf32> -> vector<16x32xf32>
    %18 = arith.addf %15, %17 : vector<16x32xf32>
    %c0_8 = arith.constant 0 : index
    %c0_9 = arith.constant 0 : index
    %19 = vector.load %arg4[%c0_8, %c0_9] : memref<1x32xf32, #tpu.memory_space<vmem>>, vector<1x32xf32>
    %20 = vector.broadcast %19 : vector<1x32xf32> to vector<16x32xf32>
    %21 = arith.addf %18, %20 : vector<16x32xf32>
    %c0_10 = arith.constant 0 : index
    %c0_11 = arith.constant 0 : index
    %22 = vector.load %arg6[%c0_10, %c0_11] : memref<16x32xf32, #tpu.memory_space<vmem>>, vector<16x32xf32>
    tpu.vector_store %arg6[%c0_10, %c0_11], %21 {strides = array<i32>} : memref<16x32xf32, #tpu.memory_space<vmem>>, vector<16x32xf32>,
    return
  }
  func.func @transform_0(%arg0: i32) -> (i32, i32) {
    %c0_i32 = arith.constant 0 : i32
    %c0_i32_0 = arith.constant 0 : i32
    return %arg0, %c0_i32 : i32, i32
  }
  func.func @transform_1(%arg0: i32) -> (i32, i32) {
    %c0_i32 = arith.constant 0 : i32
    %c0_i32_0 = arith.constant 0 : i32
    return %arg0, %c0_i32 : i32, i32
  }
  func.func @transform_2(%arg0: i32) -> (i32, i32) {
    %c0_i32 = arith.constant 0 : i32
    %c0_i32_0 = arith.constant 0 : i32
    %c0_i32_1 = arith.constant 0 : i32
    return %c0_i32, %c0_i32_0 : i32, i32
  }
  func.func @transform_3(%arg0: i32) -> (i32, i32) {
    %c0_i32 = arith.constant 0 : i32
    %c0_i32_0 = arith.constant 0 : i32
    %c0_i32_1 = arith.constant 0 : i32
    return %c0_i32, %c0_i32_0 : i32, i32
  }
  func.func @transform_4(%arg0: i32) -> (i32, i32) {
    %c0_i32 = arith.constant 0 : i32
    %c0_i32_0 = arith.constant 0 : i32
    %c0_i32_1 = arith.constant 0 : i32
    return %c0_i32, %c0_i32_0 : i32, i32
  }
  func.func @transform_5(%arg0: i32) -> (i32, i32) {
    %c0_i32 = arith.constant 0 : i32
    %c0_i32_0 = arith.constant 0 : i32
    return %arg0, %c0_i32 : i32, i32
  }
}

</mosaic_0001>

<bundles_post_ra>
// kernel: tpu_custom_call.1
= control target key start
LH: loop header
LB: loop body
LE: loop exit
PB: predicated region body
PF: predicated region fallthrough
CT: control target
= control target key end

     0   :  { %v392_v3 = vmov 0   ;;  %s499_s0 = inlined_call_operand.vmem [shape: f32[16,16], index: 0, kind: input, shape index: {}]   ;;  %s500_s1 = inlined_call_operand.vmem [shape: s32[16,1], index: 1, kind: input, shape index: {}]   ;;  %s501_s2 = inlined_call_operand.vmem [shape: f32[16,32], index: 2, kind: input, shape index: {}]   ;;  %s502_s3 = inlined_call_operand.vmem [shape: f32[1,32], index: 3, kind: input, shape index: {}]   ;;  %s503_s4 = inlined_call_operand.vmem [shape: f32[100,32], index: 4, kind: input, shape index: {}]   ;;  %s504_s5 = inlined_call_operand.hbm [shape: f32[16,32], index: 5, kind: output, shape index: {}]  }
   0x1   :  { %v24_v0 = vld [vmem:[%s500_s1 + $0x8] sm:$0xff]  ;;  %v23_v1 = vld [vmem:[%s500_s1] sm:$0xff]  ;;  %367 = vset.pattern.permute.xlu1 %v392_v3  ;;  %366 = vset.pattern.permute.xlu0 %v392_v3  ;;  %v59_v5 = vld [vmem:[%s503_s4 + $0x10] sm:$0xff] }
   0x2   :  { %v57_v2 = vld [vmem:[%s503_s4] sm:$0xff]  ;;  %vm28_vm0 = vcmp.ge.s32.totalorder %v24_v0, 0  ;;  %vm30_vm1 = vcmp.lt.s32.totalorder %v24_v0, 100  ;;  %vm27_vm2 = vcmp.ge.s32.totalorder %v23_v1, 0  ;;  %vm29_vm3 = vcmp.lt.s32.totalorder %v23_v1, 100  ;;  %v58_v4 = vld [vmem:[%s503_s4 + $0x8] sm:$0xff]  ;;  %37 = vperm.xlu1 %367, %v24_v0   ;;  %34 = vperm.xlu0 %366, %v23_v1  }
   0x3   :  { %vm32_vm4 = vmand %vm28_vm0, %vm30_vm1  ;;  %v335_v6 = vpack.c.bf16 %v58_v4, %v57_v2  ;;  %v60_v7 = vld [vmem:[%s503_s4 + $0x18] sm:$0xff]  ;;  %v61_v10 = vld [vmem:[%s503_s4 + $0x20] sm:$0xff] }
   0x4   :  { %v42_v8 = vsel %vm32_vm4, 1, %v392_v3  ;;  %vm31_vm5 = vmand %vm27_vm2, %vm29_vm3  ;;  %v339_v9 = vpack.c.bf16 %v60_v7, %v59_v5  ;;  %v62_v11 = vld [vmem:[%s503_s4 + $0x28] sm:$0xff]  ;;  %v70_v13 = vld [vmem:[%s501_s2] sm:$0xff] }
   0x5   :  { %v41_v12 = vsel %vm31_vm5, 1, %v392_v3  ;;  %336 = vmatprep.subr.bf16.mxu0 %v335_v6  ;;  %v343_v14 = vpack.c.bf16 %v62_v11, %v61_v10  ;;  %v71_v15 = vld [vmem:[%s501_s2 + $0x8] sm:$0xff] }
   0x6   :  { %338 = vmatpush3.bf16.msra.mxu0 %v335_v6  ;;  %47 = vperm.xlu1 %367, %v42_v8  }
   0x7   :  { %44 = vperm.xlu0 %366, %v41_v12  }
   0x8   :  { %10 = vsyncpa [#allocation3], 0  ;;  %340 = vmatprep.subr.bf16.mxu0 %v339_v9  ;;  %v63_v16 = vld [vmem:[%s503_s4 + $0x30] sm:$0xff]  ;;  %v64_v17 = vld [vmem:[%s503_s4 + $0x38] sm:$0xff]  ;;  %v331_v18 = vpack.c.bf16 %v71_v15, %v70_v13  ;;  %vm72_vm6 = vcmask 130048   ;;  %vm161_vm7 = vcmask 1043456   ;;  %v25_v29 = vlaneseq }
   0x9   :  { %v21_v19 = vld [vmem:[%s499_s0] sm:$0xff]  ;;  %v347_v20 = vpack.c.bf16 %v64_v17, %v63_v16  ;;  %v22_v21 = vld [vmem:[%s499_s0 + $0x8] sm:$0xff]  ;;  %v67_v25 = vld [vmem:[%s503_s4 + $0x50] sm:$0xff]  ;;  %vm154_vm13 = vcmask 818176   ;;  %v393_v35 = vmov 0.0   ;;  %s394_s28 = smov [#allocation2]  }
   0xa   :  { %342 = vmatpush3.bf16.msra.mxu0 %v339_v9  ;;  %332 = vmatprep.subr.bf16.mxu1 %v331_v18  ;;  %v65_v22 = vld [vmem:[%s503_s4 + $0x40] sm:$0xff]  ;;  %v66_v23 = vld [vmem:[%s503_s4 + $0x48] sm:$0xff]  ;;  %v68_v26 = vld [vmem:[%s503_s4 + $0x58] sm:$0xff]  ;;  %v26_v32 = vand.u32 127, %v25_v29  ;;  %s257_s29 = sshll.u32 %s394_s28, 4  ;;  %vm249_vm15 = vcmask 261120   ;;  %s258_s29 = int_to_ptr.vmem [resolvable:$true] %s257_s29 }
   0xb   :  { %344 = vmatprep.subr.bf16.mxu0 %v343_v14  ;;  %334 = vmatpush3.bf16.msra.mxu1 %v331_v18  ;;  %v351_v24 = vpack.c.bf16 %v66_v23, %v65_v22  ;;  %v355_v27 = vpack.c.bf16 %v68_v26, %v67_v25  ;;  %v69_v28 = vld [vmem:[%s503_s4 + $0x60] sm:$0xf]  ;;  %s368_s30 = scalar_lea.vmem %s258_s29, 256  ;;  %p373_p1 = scmp.lt.s32.totalorder %s258_s29, %s258_s29 }
   0xc   :  { %299 = vmatprep.mubr.msk.f32.mxu1 %vm72_vm6, %v21_v19  ;;  %v275_v41 = vld [vmem:[%s502_s3] ss:$0 sm:$0xff]  ;;  %p369_p0 = scmp.ne.s32.totalorder %s258_s29, %s368_s30  ;;  %p374_p2 = scmp.lt.s32.totalorder %s368_s30, %s368_s30 }
   0xe   :  { %346 = vmatpush3.bf16.msra.mxu0 %v343_v14  ;;  %300 = vmatmul.mubr.msk.f32.vlgmr.msra.gmra.mrb[0].mxu1 %vm72_vm6, %v22_v21  ;;  %p375_p3 = por %p374_p2, %p373_p1 }
   0xf   :  { %348 = vmatprep.subr.bf16.mxu0 %v347_v20 }
  0x10   :  { %p376_p4 = pnand %p375_p3, %p369_p0 }
  0x12   :  { %350 = vmatpush3.bf16.msra.mxu0 %v347_v20 }
  0x13   :  { %352 = vmatprep.subr.bf16.mxu0 %v351_v24 }
  0x16   :  { %354 = vmatpush3.bf16.msra.mxu0 %v351_v24 }
  0x17   :  { %356 = vmatprep.subr.bf16.mxu0 %v355_v27 }
  0x1a   :  { %358 = vmatpush3.bf16.msra.mxu0 %v355_v27 }
  0x1b   :  { %326 = vmatprep.subr.msk.mxu0 %vm161_vm7, %v69_v28 }
  0x1e   :  { %327 = vmatpush3.msk.msra.mxu0 %vm161_vm7, %v69_v28 }
  0x81   :  { %v38_v30 = vpop.permute.xlu1 %37  ;;  %v35_v31 = vpop.permute.xlu0 %34 }
  0x82   :  { %vm40_vm8 = vcmp.eq.s32.totalorder %v26_v32, %v38_v30  ;;  %vm39_vm11 = vcmp.eq.s32.totalorder %v26_v32, %v35_v31 }
  0x85   :  { %v48_v33 = vpop.permute.xlu1 %47 }
  0x86   :  { %v45_v34 = vpop.permute.xlu0 %44  ;;  %vm50_vm9 = vcmp.eq.s32.totalorder %v48_v33, 1 }
  0x87   :  { %vm49_vm10 = vcmp.eq.s32.totalorder %v45_v34, 1  ;;  %vm52_vm12 = vmand %vm40_vm8, %vm50_vm9 }
  0x88   :  { %vm51_vm14 = vmand %vm39_vm11, %vm49_vm10  ;;  %v269_v36 = vsel %vm52_vm12, 1.0, %v393_v35 }
  0x89   :  { %v268_v37 = vsel %vm51_vm14, 1.0, %v393_v35 }
  0x8a   :  { %328 = vmatprep.mubr.msk.f32.mxu0 %vm154_vm13, %v268_v37 }
  0x8b   :  { %329 = vmatmul.mubr.msk.f32.vlgmr.msra.gmra.mrb[0].mxu0 %vm154_vm13, %v269_v36 }
  0xe1   :  { %v301_v38 = vpop.f32.mrb[0].mxu1 }
  0xe2   :  { %v145_v39 = vpop.f32.mrb[1].mxu1 }
 0x15e   :  { %v330_v40 = vpop.f32.mrb[0].mxu0 }
 0x15f   :  { %v237_v42 = vadd.f32 %v330_v40, %v301_v38  ;;  %v231_v43 = vpop.f32.mrb[1].mxu0 }
 0x160   :  { %v232_v44 = vadd.f32 %v231_v43, %v145_v39 }
 0x161   :  { %v248_v45 = vadd.f32 %v275_v41, %v237_v42 }
 0x162   :  { %v247_v46 = vadd.f32 %v275_v41, %v232_v44 }
 0x163   :  { %251 = vst.msk [vmem:[#allocation2 + $0x8] sm:$0xff] %vm249_vm15, %v248_v45 }
 0x164   :  { %250 = vst.msk [vmem:[#allocation2] sm:$0xff] %vm249_vm15, %v247_v46 }
 0x165   :  { %379 = shalt.err (!%p376_p4)
}
 0x166   :  { %s380_s7 = scalar_lea.hbm %s504_s5, 256 }
 0x167   :  { %p381_p5 = scmp.ne.s32.totalorder %s504_s5, %s380_s7  ;;  %p384_p6 = scmp.lt.u32.totalorder %s380_s7, %s504_s5 }
 0x169   :  { %p386_p7 = pnand %p384_p6, %p381_p5 }
 0x16b   :  { %389 = shalt.err (!%p386_p7)
}
 0x16c   :  { %s395_s12 = smov 128   ;;  %s396_s13 = smov 8  }
 0x16d   :  { %263 = dma.vmem_to_hbm [thread:$0]  %s258_s29, 256, %s504_s5, [#allocation3], %s395_s12, %s395_s12, %s396_s13  }
 0x16e   :  { %390 = dma.done.wait [#allocation3], 256  }
 0x16f   :  { %391 = vsyncadd [#allocation3], 4294967040 }
 0x170   :  { %267 = vsyncpa [#allocation3], 1 }

</bundles_post_ra>
